<compile_context>
chip_gen: v7x
topology: tpu7x:2x2x1
jax: 0.10.0
libtpu: 0.0.40
codegen_flags: <defaults>
</compile_context>

<pallas_src>
import functools

import jax
import jax.numpy as jnp
from jax import lax
from jax.experimental import pallas as pl
from jax.experimental.pallas import tpu as pltpu

_INT32_MIN = -2147483648
_INT32_MAX = 2147483647


def _median_triplet_kernel(x_ref, tgt_full_ref, tgt_strip_ref,
                           w1_ref, b1_ref, w2_ref, b2_ref, out_ref, *,
                           n, tm, k, gamma, margin, mxu_dtype):
    i = pl.program_id(0)

    # ---- predictor: Linear -> ReLU -> Linear, biases added after the MXU ----
    x = x_ref[...].astype(mxu_dtype)
    h = jnp.maximum(
        jnp.dot(x, w1_ref[...].astype(mxu_dtype),
                preferred_element_type=jnp.float32) + b1_ref[...], 0.0)
    pred = jnp.dot(h.astype(mxu_dtype), w2_ref[...].astype(mxu_dtype),
                   preferred_element_type=jnp.float32) + b2_ref[...]

    # ---- row-wise L2 normalize (torch F.normalize, eps=1e-12) via rsqrt (EUP) ----
    # x / max(||x||, eps) == x * rsqrt(max(||x||^2, eps^2)); -2 scale folded here.
    pred_ss = jnp.sum(pred * pred, axis=1, keepdims=True)
    pred_n = pred * (-2.0 * lax.rsqrt(jnp.maximum(pred_ss, 1e-24)))       # (tm, d)

    t_full = tgt_full_ref[...]
    t_full_n = t_full * lax.rsqrt(
        jnp.maximum(jnp.sum(t_full * t_full, axis=1, keepdims=True), 1e-24))
    t_strip = tgt_strip_ref[...]
    t_strip_n = t_strip * lax.rsqrt(
        jnp.maximum(jnp.sum(t_strip * t_strip, axis=1, keepdims=True), 1e-24))

    # ---- dist strip == -2 * pred_norm @ target_norm.T (scale already folded);
    #      contract dim 1 of both operands -> no explicit transpose of t_full_n ----
    dist = lax.dot_general(pred_n.astype(mxu_dtype), t_full_n.astype(mxu_dtype),
                           (((1,), (1,)), ((), ())),
                           preferred_element_type=jnp.float32)            # (tm, n)

    # dist_ap[r] = dist[r, g(r)] computed directly as a row dot product (f32).
    dist_ap = jnp.sum(pred_n * t_strip_n, axis=1, keepdims=True)          # (tm, 1)

    # ---- diagonal sentinel: +inf so the rank-k (k <= n-2) selection never hits it ----
    grow = lax.broadcasted_iota(jnp.int32, (tm, 1), 0) + i * tm           # global row ids
    col = lax.broadcasted_iota(jnp.int32, (tm, n), 1)
    masked = jnp.where(col == grow, jnp.inf, dist)                        # (tm, n)

    # ---- dist_an[r] = k-th smallest entry of masked row r (exact), via 32-step
    #      bisection on a monotone int32 reinterpretation of the f32 bits.
    #      key(b) = b            if b >= 0   (positive floats, +0, +inf)
    #             = INT_MIN - b  if b <  0   (negative floats, reversed order)
    #      so float order == signed int32 key order. ----
    bits = pltpu.bitcast(masked, jnp.int32)
    int_min = jnp.int32(_INT32_MIN)
    keys = jnp.where(bits >= 0, bits, int_min - bits)                     # (tm, n)
    lo0 = jnp.full((tm, 1), _INT32_MIN, jnp.int32)    # invariant: lo < answer <= hi
    hi0 = jnp.full((tm, 1), _INT32_MAX, jnp.int32)

    def bisect(_, carry):
        lo, hi = carry
        mid = (lo & hi) + ((lo ^ hi) >> 1)            # overflow-free floor average
        cnt = jnp.sum((keys <= mid).astype(jnp.int32), axis=1, keepdims=True)
        down = cnt >= (k + 1)                         # answer <= mid
        return jnp.where(down, lo, mid), jnp.where(down, mid, hi)

    _, hi = lax.fori_loop(0, 32, bisect, (lo0, hi0))  # 32 steps cover the int32 range
    sel_bits = jnp.where(hi >= 0, hi, int_min - hi)   # invert the monotone key map
    dist_an = pltpu.bitcast(sel_bits, jnp.float32)                        # (tm, 1)

    # ---- MarginRankingLoss(dist_an, gamma*dist_ap, y=1): relu(gamma*ap - an + m) ----
    per_row = jnp.maximum(gamma * dist_ap - dist_an + margin, 0.0)
    per_row = jnp.where(grow < n, per_row, 0.0)       # drop padded rows of last strip
    out_ref[0, 0] = jnp.sum(per_row)


def median_triplet_head(x, target, w1, b1, w2, b2, *, gamma, margin=100.0,
                        mxu_dtype=jnp.float32):
    n, d_in = x.shape
    d_hid = w1.shape[1]
    d_out = w2.shape[1]
    assert n >= 2, "median over the n-1 off-diagonal entries requires n >= 2"
    assert target.shape == (n, d_out)

    tm = n if n <= 128 else 128               # rows per grid step (strip)
    num_strips = pl.cdiv(n, tm)
    k = (n - 2) // 2                          # torch lower median of n-1 elements

    b1 = b1.reshape(1, d_hid)
    b2 = b2.reshape(1, d_out)

    kernel = functools.partial(_median_triplet_kernel, n=n, tm=tm, k=k,
                               gamma=float(gamma), margin=float(margin),
                               mxu_dtype=mxu_dtype)

    # Selection is now ~32 * 3 ops per dist element (compare + cast + reduce).
    flops = (2 * n * d_in * d_hid + 2 * n * d_hid * d_out
             + 2 * n * n * d_out + 96 * n * n)
    bytes_accessed = 4 * (n * d_in + (num_strips + 1) * n * d_out
                          + d_in * d_hid + d_hid + d_hid * d_out + d_out
                          + num_strips)

    partial_sums = pl.pallas_call(
        kernel,
        grid=(num_strips,),
        out_shape=jax.ShapeDtypeStruct((num_strips, 1), jnp.float32),
        in_specs=[
            pl.BlockSpec((tm, d_in), lambda i: (i, 0)),       # x strip
            pl.BlockSpec((n, d_out), lambda i: (0, 0)),       # full target (dist columns)
            pl.BlockSpec((tm, d_out), lambda i: (i, 0)),      # target strip (diagonal)
            pl.BlockSpec((d_in, d_hid), lambda i: (0, 0)),    # W1
            pl.BlockSpec((1, d_hid), lambda i: (0, 0)),       # b1
            pl.BlockSpec((d_hid, d_out), lambda i: (0, 0)),   # W2
            pl.BlockSpec((1, d_out), lambda i: (0, 0)),       # b2
        ],
        out_specs=pl.BlockSpec((1, 1), lambda i: (i, 0),
                               memory_space=pltpu.MemorySpace.SMEM),
        compiler_params=pltpu.CompilerParams(
            dimension_semantics=("parallel",)),
        cost_estimate=pl.CostEstimate(flops=flops, transcendentals=3 * n,
                                      bytes_accessed=bytes_accessed),
    )(x, target, target, w1, b1, w2, b2)

    return jnp.sum(partial_sums) * (1.0 / n)


if __name__ == "__main__":
    n, d_in, d_hid, d_out = 8, 32, 64, 32
    gamma = 2.0

    key = jax.random.PRNGKey(0)
    ks = jax.random.split(key, 6)
    x = jax.random.normal(ks[0], (n, d_in), jnp.float32)
    target = jax.random.normal(ks[1], (n, d_out), jnp.float32)
    # deterministic synthetic predictor parameters
    w1 = jax.random.normal(ks[2], (d_in, d_hid), jnp.float32) * 0.05
    b1 = jax.random.normal(ks[3], (1, d_hid), jnp.float32) * 0.01
    w2 = jax.random.normal(ks[4], (d_hid, d_out), jnp.float32) * 0.05
    b2 = jax.random.normal(ks[5], (1, d_out), jnp.float32) * 0.01

    loss = median_triplet_head(x, target, w1, b1, w2, b2, gamma=gamma)
    loss = jax.block_until_ready(loss)

    # pure-JAX reference (sort-based median) for a correctness gate
    def ref():
        h = jnp.maximum(x @ w1 + b1, 0.0)
        pred = h @ w2 + b2
        pn = pred / jnp.maximum(jnp.linalg.norm(pred, axis=1, keepdims=True), 1e-12)
        tn = target / jnp.maximum(jnp.linalg.norm(target, axis=1, keepdims=True), 1e-12)
        dist = -2.0 * pn @ tn.T
        dist_ap = jnp.diag(dist)
        eye = jnp.eye(n, dtype=bool)
        srt = jnp.sort(jnp.where(eye, jnp.inf, dist), axis=1)
        dist_an = srt[:, (n - 2) // 2]
        return jnp.mean(jnp.maximum(gamma * dist_ap - dist_an + 100.0, 0.0))

    r = jax.block_until_ready(ref())
    assert abs(float(loss) - float(r)) < 1e-3, (float(loss), float(r))
    print("KERNEL_OK")
</pallas_src>

<mosaic_0001>
module attributes {stable_mosaic.version = 11 : i64} {
  func.func @_median_triplet_kernel(%arg0: i32, %arg1: memref<8x32xf32, #tpu.memory_space<vmem>>, %arg2: memref<8x32xf32, #tpu.memory_space<vmem>>, %arg3: memref<8x32xf32, #tpu.memory_space<vmem>>, %arg4: memref<32x64xf32, #tpu.memory_space<vmem>>, %arg5: memref<1x64xf32, #tpu.memory_space<vmem>>, %arg6: memref<64x32xf32, #tpu.memory_space<vmem>>, %arg7: memref<1x32xf32, #tpu.memory_space<vmem>>, %arg8: memref<1x1xf32, #tpu.memory_space<smem>>) attributes {dimension_semantics = [#tpu.dimension_semantics<parallel>], iteration_bounds = array<i64: 1>, scalar_prefetch = 0 : i64, scratch_operands = 0 : i64, tpu.core_type = #tpu.core_type<tc>, window_params = [{transform_indices = @transform_0, window_bounds = array<i64: 8, 32>}, {pipeline_mode = #tpu.pipeline_mode<synchronous>, transform_indices = @transform_1, window_bounds = array<i64: 8, 32>}, {transform_indices = @transform_2, window_bounds = array<i64: 8, 32>}, {pipeline_mode = #tpu.pipeline_mode<synchronous>, transform_indices = @transform_3, window_bounds = array<i64: 32, 64>}, {pipeline_mode = #tpu.pipeline_mode<synchronous>, transform_indices = @transform_4, window_bounds = array<i64: 1, 64>}, {pipeline_mode = #tpu.pipeline_mode<synchronous>, transform_indices = @transform_5, window_bounds = array<i64: 64, 32>}, {pipeline_mode = #tpu.pipeline_mode<synchronous>, transform_indices = @transform_6, window_bounds = array<i64: 1, 32>}, {transform_indices = @transform_7, window_bounds = array<i64: 1, 1>}]} {
    %c0 = arith.constant 0 : index
    %c0_0 = arith.constant 0 : index
    %0 = vector.load %arg1[%c0, %c0_0] : memref<8x32xf32, #tpu.memory_space<vmem>>, vector<8x32xf32>
    %c0_1 = arith.constant 0 : index
    %c0_2 = arith.constant 0 : index
    %1 = vector.load %arg4[%c0_1, %c0_2] : memref<32x64xf32, #tpu.memory_space<vmem>>, vector<32x64xf32>
    %cst = arith.constant dense<0.000000e+00> : vector<8x64xf32>
    %2 = tpu.matmul %0, %1, %cst {dimension_numbers = #tpu.dot_dimension_numbers<[1], [0], [0], [1], [0, 0, 1, 1], [], []>} : vector<8x32xf32>, vector<32x64xf32>, vector<8x64xf32> -> vector<8x64xf32>
    %c0_3 = arith.constant 0 : index
    %c0_4 = arith.constant 0 : index
    %3 = vector.load %arg5[%c0_3, %c0_4] : memref<1x64xf32, #tpu.memory_space<vmem>>, vector<1x64xf32>
    %4 = vector.broadcast %3 : vector<1x64xf32> to vector<8x64xf32>
    %5 = arith.addf %2, %4 : vector<8x64xf32>
    %cst_5 = arith.constant 0.000000e+00 : f32
    %6 = vector.broadcast %cst_5 : f32 to vector<8x64xf32>
    %7 = arith.maximumf %5, %6 : vector<8x64xf32>
    %c0_6 = arith.constant 0 : index
    %c0_7 = arith.constant 0 : index
    %8 = vector.load %arg6[%c0_6, %c0_7] : memref<64x32xf32, #tpu.memory_space<vmem>>, vector<64x32xf32>
    %cst_8 = arith.constant dense<0.000000e+00> : vector<8x32xf32>
    %9 = tpu.matmul %7, %8, %cst_8 {dimension_numbers = #tpu.dot_dimension_numbers<[1], [0], [0], [1], [0, 0, 1, 1], [], []>} : vector<8x64xf32>, vector<64x32xf32>, vector<8x32xf32> -> vector<8x32xf32>
    %c0_9 = arith.constant 0 : index
    %c0_10 = arith.constant 0 : index
    %10 = vector.load %arg7[%c0_9, %c0_10] : memref<1x32xf32, #tpu.memory_space<vmem>>, vector<1x32xf32>
    %11 = vector.broadcast %10 : vector<1x32xf32> to vector<8x32xf32>
    %12 = arith.addf %9, %11 : vector<8x32xf32>
    %13 = arith.mulf %12, %12 : vector<8x32xf32>
    %cst_11 = arith.constant dense<0.000000e+00> : vector<8xf32>
    %14 = vector.multi_reduction <add>, %13, %cst_11 [1] : vector<8x32xf32> to vector<8xf32>
    %15 = vector.shape_cast %14 : vector<8xf32> to vector<8x1xf32>
    %cst_12 = arith.constant 1.000000e-24 : f32
    %16 = vector.broadcast %cst_12 : f32 to vector<8x1xf32>
    %17 = arith.maximumf %15, %16 : vector<8x1xf32>
    %18 = math.rsqrt %17 : vector<8x1xf32>
    %cst_13 = arith.constant -2.000000e+00 : f32
    %19 = vector.broadcast %cst_13 : f32 to vector<8x1xf32>
    %20 = arith.mulf %19, %18 : vector<8x1xf32>
    %21 = vector.broadcast %20 : vector<8x1xf32> to vector<8x32xf32>
    %22 = arith.mulf %12, %21 : vector<8x32xf32>
    %c0_14 = arith.constant 0 : index
    %c0_15 = arith.constant 0 : index
    %23 = vector.load %arg2[%c0_14, %c0_15] : memref<8x32xf32, #tpu.memory_space<vmem>>, vector<8x32xf32>
    %24 = arith.mulf %23, %23 : vector<8x32xf32>
    %cst_16 = arith.constant dense<0.000000e+00> : vector<8xf32>
    %25 = vector.multi_reduction <add>, %24, %cst_16 [1] : vector<8x32xf32> to vector<8xf32>
    %26 = vector.shape_cast %25 : vector<8xf32> to vector<8x1xf32>
    %cst_17 = arith.constant 1.000000e-24 : f32
    %27 = vector.broadcast %cst_17 : f32 to vector<8x1xf32>
    %28 = arith.maximumf %26, %27 : vector<8x1xf32>
    %29 = math.rsqrt %28 : vector<8x1xf32>
    %30 = vector.broadcast %29 : vector<8x1xf32> to vector<8x32xf32>
    %31 = arith.mulf %23, %30 : vector<8x32xf32>
    %c0_18 = arith.constant 0 : index
    %c0_19 = arith.constant 0 : index
    %32 = vector.load %arg3[%c0_18, %c0_19] : memref<8x32xf32, #tpu.memory_space<vmem>>, vector<8x32xf32>
    %33 = arith.mulf %32, %32 : vector<8x32xf32>
    %cst_20 = arith.constant dense<0.000000e+00> : vector<8xf32>
    %34 = vector.multi_reduction <add>, %33, %cst_20 [1] : vector<8x32xf32> to vector<8xf32>
    %35 = vector.shape_cast %34 : vector<8xf32> to vector<8x1xf32>
    %cst_21 = arith.constant 1.000000e-24 : f32
    %36 = vector.broadcast %cst_21 : f32 to vector<8x1xf32>
    %37 = arith.maximumf %35, %36 : vector<8x1xf32>
    %38 = math.rsqrt %37 : vector<8x1xf32>
    %39 = vector.broadcast %38 : vector<8x1xf32> to vector<8x32xf32>
    %40 = arith.mulf %32, %39 : vector<8x32xf32>
    %cst_22 = arith.constant dense<0.000000e+00> : vector<8x8xf32>
    %41 = tpu.matmul %22, %31, %cst_22 {dimension_numbers = #tpu.dot_dimension_numbers<[1], [1], [0], [0], [0, 0, 1, 0], [], []>} : vector<8x32xf32>, vector<8x32xf32>, vector<8x8xf32> -> vector<8x8xf32>
    %42 = arith.mulf %22, %40 : vector<8x32xf32>
    %cst_23 = arith.constant dense<0.000000e+00> : vector<8xf32>
    %43 = vector.multi_reduction <add>, %42, %cst_23 [1] : vector<8x32xf32> to vector<8xf32>
    %44 = vector.shape_cast %43 : vector<8xf32> to vector<8x1xf32>
    %45 = tpu.iota {dimensions = array<i32: 0>} : vector<8x1xi32>
    %c8_i32 = arith.constant 8 : i32
    %46 = arith.muli %arg0, %c8_i32 : i32
    %47 = vector.broadcast %46 : i32 to vector<8x1xi32>
    %48 = arith.addi %45, %47 : vector<8x1xi32>
    %49 = tpu.iota {dimensions = array<i32: 1>} : vector<8x8xi32>
    %50 = vector.broadcast %48 : vector<8x1xi32> to vector<8x8xi32>
    %51 = arith.cmpi eq, %49, %50 : vector<8x8xi32>
    %cst_24 = arith.constant 0x7F800000 : f32
    %52 = vector.broadcast %cst_24 : f32 to vector<8x8xf32>
    %53 = arith.select %51, %52, %41 : vector<8x8xi1>, vector<8x8xf32>
    %54 = tpu.bitcast %53 : vector<8x8xf32> -> vector<8x8xi32>
    %c0_i32 = arith.constant 0 : i32
    %55 = vector.broadcast %c0_i32 : i32 to vector<8x8xi32>
    %56 = arith.cmpi sge, %54, %55 : vector<8x8xi32>
    %c-2147483648_i32 = arith.constant -2147483648 : i32
    %57 = vector.broadcast %c-2147483648_i32 : i32 to vector<8x8xi32>
    %58 = arith.subi %57, %54 : vector<8x8xi32>
    %59 = arith.select %56, %54, %58 : vector<8x8xi1>, vector<8x8xi32>
    %c-2147483648_i32_25 = arith.constant -2147483648 : i32
    %60 = vector.broadcast %c-2147483648_i32_25 : i32 to vector<8x1xi32>
    %c2147483647_i32 = arith.constant 2147483647 : i32
    %61 = vector.broadcast %c2147483647_i32 : i32 to vector<8x1xi32>
    %c0_i32_26 = arith.constant 0 : i32
    %c32_i32 = arith.constant 32 : i32
    %62 = arith.addi %c0_i32_26, %c32_i32 : i32
    %c1_i32 = arith.constant 1 : i32
    %63:2 = scf.for %arg9 = %c0_i32_26 to %62 step %c1_i32 iter_args(%arg10 = %60, %arg11 = %61) -> (vector<8x1xi32>, vector<8x1xi32>)  : i32 {
      %86 = arith.andi %arg10, %arg11 : vector<8x1xi32>
      %87 = arith.xori %arg10, %arg11 : vector<8x1xi32>
      %c1_i32_37 = arith.constant 1 : i32
      %88 = vector.broadcast %c1_i32_37 : i32 to vector<8x1xi32>
      %89 = arith.shrsi %87, %88 : vector<8x1xi32>
      %90 = arith.addi %86, %89 : vector<8x1xi32>
      %91 = vector.broadcast %90 : vector<8x1xi32> to vector<8x8xi32>
      %92 = arith.cmpi sle, %59, %91 : vector<8x8xi32>
      %93 = arith.extui %92 : vector<8x8xi1> to vector<8x8xi32>
      %cst_38 = arith.constant dense<0> : vector<8xi32>
      %94 = vector.multi_reduction <add>, %93, %cst_38 [1] : vector<8x8xi32> to vector<8xi32>
      %95 = vector.shape_cast %94 : vector<8xi32> to vector<8x1xi32>
      %c4_i32 = arith.constant 4 : i32
      %96 = vector.broadcast %c4_i32 : i32 to vector<8x1xi32>
      %97 = arith.cmpi sge, %95, %96 : vector<8x1xi32>
      %98 = arith.select %97, %arg10, %90 : vector<8x1xi1>, vector<8x1xi32>
      %99 = arith.select %97, %90, %arg11 : vector<8x1xi1>, vector<8x1xi32>
      scf.yield %98, %99 : vector<8x1xi32>, vector<8x1xi32>
    }
    %c0_i32_27 = arith.constant 0 : i32
    %64 = vector.broadcast %c0_i32_27 : i32 to vector<8x1xi32>
    %65 = arith.cmpi sge, %63#1, %64 : vector<8x1xi32>
    %c-2147483648_i32_28 = arith.constant -2147483648 : i32
    %66 = vector.broadcast %c-2147483648_i32_28 : i32 to vector<8x1xi32>
    %67 = arith.subi %66, %63#1 : vector<8x1xi32>
    %68 = arith.select %65, %63#1, %67 : vector<8x1xi1>, vector<8x1xi32>
    %69 = tpu.bitcast %68 : vector<8x1xi32> -> vector<8x1xf32>
    %cst_29 = arith.constant 2.000000e+00 : f32
    %70 = vector.broadcast %cst_29 : f32 to vector<8x1xf32>
    %71 = arith.mulf %70, %44 : vector<8x1xf32>
    %72 = arith.subf %71, %69 : vector<8x1xf32>
    %cst_30 = arith.constant 1.000000e+02 : f32
    %73 = vector.broadcast %cst_30 : f32 to vector<8x1xf32>
    %74 = arith.addf %72, %73 : vector<8x1xf32>
    %cst_31 = arith.constant 0.000000e+00 : f32
    %75 = vector.broadcast %cst_31 : f32 to vector<8x1xf32>
    %76 = arith.maximumf %74, %75 : vector<8x1xf32>
    %c8_i32_32 = arith.constant 8 : i32
    %77 = vector.broadcast %c8_i32_32 : i32 to vector<8x1xi32>
    %78 = arith.cmpi slt, %48, %77 : vector<8x1xi32>
    %cst_33 = arith.constant 0.000000e+00 : f32
    %79 = vector.broadcast %cst_33 : f32 to vector<8x1xf32>
    %80 = arith.select %78, %76, %79 : vector<8x1xi1>, vector<8x1xf32>
    %81 = vector.shape_cast %80 : vector<8x1xf32> to vector<1x8x1xf32>
    %cst_34 = arith.constant dense<0.000000e+00> : vector<1xf32>
    %82 = vector.multi_reduction <add>, %81, %cst_34 [1, 2] : vector<1x8x1xf32> to vector<1xf32>
    %83 = vector.shape_cast %82 : vector<1xf32> to vector<1x1x1xf32>
    %84 = vector.extract %83[0, 0, 0] : f32 from vector<1x1x1xf32>
    %c0_35 = arith.constant 0 : index
    %c0_36 = arith.constant 0 : index
    %85 = memref.load %arg8[%c0_35, %c0_36] : memref<1x1xf32, #tpu.memory_space<smem>>
    memref.store %84, %arg8[%c0_35, %c0_36] : memref<1x1xf32, #tpu.memory_space<smem>>
    return
  }
  func.func @transform_0(%arg0: i32) -> (i32, i32) {
    %c0_i32 = arith.constant 0 : i32
    %c0_i32_0 = arith.constant 0 : i32
    return %arg0, %c0_i32 : i32, i32
  }
  func.func @transform_1(%arg0: i32) -> (i32, i32) {
    %c0_i32 = arith.constant 0 : i32
    %c0_i32_0 = arith.constant 0 : i32
    %c0_i32_1 = arith.constant 0 : i32
    return %c0_i32, %c0_i32_0 : i32, i32
  }
  func.func @transform_2(%arg0: i32) -> (i32, i32) {
    %c0_i32 = arith.constant 0 : i32
    %c0_i32_0 = arith.constant 0 : i32
    return %arg0, %c0_i32 : i32, i32
  }
  func.func @transform_3(%arg0: i32) -> (i32, i32) {
    %c0_i32 = arith.constant 0 : i32
    %c0_i32_0 = arith.constant 0 : i32
    %c0_i32_1 = arith.constant 0 : i32
    return %c0_i32, %c0_i32_0 : i32, i32
  }
  func.func @transform_4(%arg0: i32) -> (i32, i32) {
    %c0_i32 = arith.constant 0 : i32
    %c0_i32_0 = arith.constant 0 : i32
    %c0_i32_1 = arith.constant 0 : i32
    return %c0_i32, %c0_i32_0 : i32, i32
  }
  func.func @transform_5(%arg0: i32) -> (i32, i32) {
    %c0_i32 = arith.constant 0 : i32
    %c0_i32_0 = arith.constant 0 : i32
    %c0_i32_1 = arith.constant 0 : i32
    return %c0_i32, %c0_i32_0 : i32, i32
  }
  func.func @transform_6(%arg0: i32) -> (i32, i32) {
    %c0_i32 = arith.constant 0 : i32
    %c0_i32_0 = arith.constant 0 : i32
    %c0_i32_1 = arith.constant 0 : i32
    return %c0_i32, %c0_i32_0 : i32, i32
  }
  func.func @transform_7(%arg0: i32) -> (i32, i32) {
    %c0_i32 = arith.constant 0 : i32
    %c0_i32_0 = arith.constant 0 : i32
    return %arg0, %c0_i32 : i32, i32
  }
}

</mosaic_0001>

<bundles_post_ra>
// kernel: tpu_custom_call.1
= control target key start
LH: loop header
LB: loop body
LE: loop exit
PB: predicated region body
PF: predicated region fallthrough
CT: control target
= control target key end

     0   :  { %12 = vsyncpa [#allocation3], 0  ;;  %v546_v2 = vmov 0.0|0.0   ;;  %vm547_vm0 = vmmov 0   ;;  %v548_v6 = vmov 0.0   ;;  %vm39_vm1 = vcmask 261120   ;;  %s672_s0 = inlined_call_operand.vmem [shape: f32[8,32], index: 0, kind: input, shape index: {}]   ;;  %s673_s1 = inlined_call_operand.vmem [shape: f32[8,32], index: 1, kind: input, shape index: {}]   ;;  %s674_s2 = inlined_call_operand.vmem [shape: f32[8,32], index: 2, kind: input, shape index: {}]   ;;  %s675_s3 = inlined_call_operand.vmem [shape: f32[32,64], index: 3, kind: input, shape index: {}]   ;;  %s676_s4 = inlined_call_operand.vmem [shape: f32[1,64], index: 4, kind: input, shape index: {}]   ;;  %s677_s5 = inlined_call_operand.vmem [shape: f32[64,32], index: 5, kind: input, shape index: {}]   ;;  %s678_s6 = inlined_call_operand.vmem [shape: f32[1,32], index: 6, kind: input, shape index: {}]   ;;  %s679_s7 = inlined_call_operand.hbm [shape: f32[1,1], index: 7, kind: output, shape index: {}]  }
   0x1   :  { %v28_v0 = vld [vmem:[%s675_s3] sm:$0xff]  ;;  %v29_v1 = vld [vmem:[%s675_s3 + $0x8] sm:$0xff]  ;;  %455 = vmatprep.subr.bf16.mxu0 %v546_v2  ;;  %v30_v4 = vld [vmem:[%s675_s3 + $0x10] sm:$0xff]  ;;  %461 = vmatprep.subr.bf16.mxu1 %v546_v2  ;;  %vm129_vm2 = vcmask 523264   ;;  %v307_v54 = vlaneseq  ;;  %v534_v62 = vmov 2147483647  }
   0x2   :  { %v456_v3 = vpack.c.bf16 %v29_v1, %v28_v0  ;;  %v31_v5 = vld [vmem:[%s675_s3 + $0x18] sm:$0xff]  ;;  %428 = vmatprep.mubr.msk.f32.mxu0 %vm547_vm0, %v548_v6  ;;  %v114_v7 = vld [vmem:[%s677_s5] sm:$0xff]  ;;  %v115_v8 = vld [vmem:[%s677_s5 + $0x8] sm:$0xff]  ;;  %447 = vmatprep.mubr.msk.f32.mxu1 %vm547_vm0, %v548_v6  ;;  %v538_v63 = vmov 2147483648  }
   0x3   :  { %v116_v9 = vld [vmem:[%s677_s5 + $0x10] sm:$0xff]  ;;  %v459_v10 = vpack.c.bf16 %v31_v5, %v30_v4  ;;  %v462_v11 = vpack.c.bf16 %v115_v8, %v114_v7  ;;  %v117_v12 = vld [vmem:[%s677_s5 + $0x18] sm:$0xff]  ;;  %v118_v14 = vld [vmem:[%s677_s5 + $0x20] sm:$0xff]  ;;  %v308_v55 = vshrl.u32 %v307_v54, 7  ;;  %v313_v56 = vand.u32 127, %v307_v54 }
   0x4   :  { %457 = vmatpush3.bf16.msra.mxu0 %v456_v3  ;;  %v465_v13 = vpack.c.bf16 %v117_v12, %v116_v9  ;;  %v119_v15 = vld [vmem:[%s677_s5 + $0x28] sm:$0xff]  ;;  %v27_v16 = vld [vmem:[%s672_s0] sm:$0xff]  ;;  %v120_v18 = vld [vmem:[%s677_s5 + $0x30] sm:$0xff] }
   0x5   :  { %458 = vmatprep.subr.bf16.mxu0 %v546_v2  ;;  %463 = vmatpush3.bf16.msra.mxu1 %v462_v11  ;;  %v468_v17 = vpack.c.bf16 %v119_v15, %v118_v14  ;;  %v121_v19 = vld [vmem:[%s677_s5 + $0x38] sm:$0xff]  ;;  %v398_v21 = vld [vmem:[%s676_s4] ss:$0 sm:$0xff]  ;;  %vm314_vm3 = vcmp.eq.s32.totalorder %v313_v56, %v308_v55 }
   0x6   :  { %464 = vmatprep.subr.bf16.mxu1 %v546_v2  ;;  %v471_v20 = vpack.c.bf16 %v121_v19, %v120_v18  ;;  %v211_v26 = vld [vmem:[%s673_s1] sm:$0xff]  ;;  %s652_s1 = smov 0  }
   0x7   :  { %v212_v27 = vmul.f32 %v211_v26, %v211_v26  ;;  %v219_v29 = vld [vmem:[%s674_s2] sm:$0xff] }
   0x8   :  { %460 = vmatpush3.bf16.msra.mxu0 %v459_v10  ;;  %v220_v30 = vmul.f32 %v219_v29, %v219_v29  ;;  %v400_v32 = vld [vmem:[%s678_s6] ss:$0 sm:$0xff] }
   0x9   :  { %450 = vmatprep.subr.mxu0 %v548_v6  ;;  %466 = vmatpush3.bf16.msra.mxu1 %v465_v13  ;;  %v213_v28 = vsel %vm39_vm1, %v212_v27, 0.0 }
   0xa   :  { %467 = vmatprep.subr.bf16.mxu1 %v546_v2  ;;  %214 = vadd.xlane.f32.xlu0 %v213_v28  ;;  %v221_v31 = vsel %vm39_vm1, %v220_v30, 0.0 }
   0xb   :  { %429 = vmatmul.mubr.msk.f32.vlgmr.msra.gmra.mrb[0].mxu0 %vm39_vm1, %v27_v16  ;;  %222 = vadd.xlane.f32.xlu1 %v221_v31 }
   0xc   :  { %452 = vmatprep.mubr.msk.f32.mxu0 %vm547_vm0, %v548_v6 }
   0xd   :  { %469 = vmatpush3.bf16.msra.mxu1 %v468_v17 }
   0xe   :  { %470 = vmatprep.subr.bf16.mxu1 %v546_v2 }
  0x11   :  { %472 = vmatpush3.bf16.msra.mxu1 %v471_v20 }
  0x97   :  { %v215_v38 = vpop.xlane.xlu0 %214 }
  0x98   :  { %v216_v39 = vmax.f32 %v215_v38, 1e-24  ;;  %v223_v42 = vpop.xlane.xlu1 %222 }
  0x99   :  { %v224_v43 = vmax.f32 %v223_v42, 1e-24 }
  0x9a   :  { %504 = vrsqrt.f32 %v216_v39 }
  0x9b   :  { %506 = vrsqrt.f32 %v224_v43 }
  0xa4   :  { %v505_v40 = vpop.eup %504 }
  0xa5   :  { %v218_v41 = vmul.f32 %v505_v40, %v211_v26  ;;  %v507_v46 = vpop.eup %506 }
  0xa6   :  { %v226_v49 = vmul.f32 %v507_v46, %v219_v29 }
  0xa7   :  { %451 = vmatpush3.xpose.msk.msra.mxu0 %vm39_vm1, %v218_v41 }
  0xde   :  { %v109_v22 = vpop.f32.mrb[0].mxu0 }
  0xdf   :  { %v110_v23 = vadd.f32 %v398_v21, %v109_v22  ;;  %v430_v24 = vpop.f32.mrb[1].mxu0 }
  0xe1   :  { %v113_v25 = vmax.f32 %v110_v23, 0.0 }
  0xe3   :  { %448 = vmatmul.mubr.msk.f32.vlgmr.msra.gmra.mrb[0].mxu1 %vm129_vm2, %v113_v25 }
 0x1b6   :  { %v199_v33 = vpop.f32.mrb[0].mxu1 }
 0x1b7   :  { %v200_v34 = vadd.f32 %v400_v32, %v199_v33  ;;  %v449_v35 = vpop.f32.mrb[1].mxu1 }
 0x1b9   :  { %v203_v36 = vmul.f32 %v200_v34, %v200_v34 }
 0x1bb   :  { %v204_v37 = vsel %vm39_vm1, %v203_v36, 0.0 }
 0x1bc   :  { %205 = vadd.xlane.f32.xlu0 %v204_v37 }
 0x249   :  { %v206_v44 = vpop.xlane.xlu0 %205 }
 0x24a   :  { %v207_v45 = vmax.f32 %v206_v44, 1e-24 }
 0x24c   :  { %508 = vrsqrt.f32 %v207_v45 }
 0x256   :  { %v509_v47 = vpop.eup %508 }
 0x257   :  { %v209_v48 = vmul.f32 -2.0, %v509_v47 }
 0x259   :  { %v210_v50 = vmul.f32 %v209_v48, %v200_v34 }
 0x25b   :  { %453 = vmatmul.mubr.msk.f32.vlgmr.msra.gmra.mrb[2].mxu0 %vm39_vm1, %v210_v50  ;;  %v303_v51 = vmul.f32 %v226_v49, %v210_v50 }
 0x25d   :  { %v304_v52 = vsel %vm39_vm1, %v303_v51, 0.0 }
 0x25e   :  { %305 = vadd.xlane.f32.xlu1 %v304_v52 }
 0x2eb   :  { %v306_v53 = vpop.xlane.xlu1 %305 }
 0x32e   :  { %v299_v57 = vpop.f32.mrb[2].mxu0 }
 0x32f   :  { %v315_v58 = vsel %vm314_vm3, inf, %v299_v57  ;;  %v454_v59 = vpop.f32.mrb[3].mxu0 }
 0x330   :  { %vm317_vm4 = vcmp.ge.s32.totalorder %v315_v58, 0  ;;  %v318_v60 = vsub.s32 2147483648, %v315_v58 }
 0x332   :  { %v319_v61 = vsel %vm317_vm4, %v315_v58, %v318_v60 }
 0x333 LB: > { %v328_v0 = vand.u32 %v536_v62, %v540_v63  ;;  %v329_v1 = vxor.u32 %v536_v62, %v540_v63  ;;  %vm334_vm5 = vcmask 64512   ;;  %v549_v4 = vmov 0   ;;  %s325_s1 = sadd.s32 1, %s544_s1   ;;  %s544_s1 = sphi %s652_s1, %s325_s1   ;;  %v540_v63 = vphi %v538_v63, %v349_v63   ;;  %v536_v62 = vphi %v534_v62, %v535_v62  }
 0x334   : > { %p322_p0 = scmp.ge.s32.totalorder %s325_s1, 32  }
 0x335   : > { %v330_v2 = vshra.s32 %v329_v1, 1  ;;  %v355_v19 = vmul.f32 (%p322_p0), 2.0, %v306_v53  ;;  %vm361_vm9 = vcmask (%p322_p0), 7168   ;;  %s510_s9 = scalar_lea.hbm (%p322_p0), %s679_s7, 16 }
 0x336   :  { %p511_p1 = scmp.ne.s32.totalorder (%p322_p0), %s679_s7, %s510_s9  ;;  %p514_p2 = scmp.lt.u32.totalorder (%p322_p0), %s510_s9, %s679_s7 }
 0x337   : > { %v331_v3 = vadd.s32 %v330_v2, %v328_v0 }
 0x338   :  { %p516_p3 = pnand (%p322_p0), %p514_p2, %p511_p1 }
 0x339   : > { %vm332_vm6 = vcmp.le.s32.totalorder %v319_v61, %v331_v3 }
 0x33a   : > { %v333_v5 = vsel %vm332_vm6, 1, %v549_v4 }
 0x33b   : > { %v335_v6 = vsel %vm334_vm5, %v333_v5, 0 }
 0x33c   : > { %v337_v7 = vshrl.u32 %v335_v6, 16  ;;  %v336_v8 = vand.u32 65535, %v335_v6 }
 0x33e   : > { %v339_v9 = vcvt.s32.f32 %v337_v7  ;;  %v338_v10 = vcvt.s32.f32 %v336_v8 }
 0x340   : > { %342 = vadd.xlane.f32.xlu0 %v339_v9 }
 0x344   : > { %340 = vadd.xlane.f32.xlu0 %v338_v10 }
 0x3cd   : > { %v343_v11 = vpop.xlane.xlu0 %342 }
 0x3ce   : > { %v345_v12 = vcvt.f32.s32 %v343_v11 }
 0x3d0   : > { %v346_v14 = vshll.u32 %v345_v12, 16 }
 0x3d1   : > { %v341_v13 = vpop.xlane.xlu0 %340 }
 0x3d2   : > { %v344_v15 = vcvt.f32.s32 %v341_v13  ;;  %324 = sbr.rel (!%p322_p0) target bundleno = 819 (0x333), region = 56 }
 0x3d4   : > { %v347_v16 = vadd.s32 %v346_v14, %v344_v15 }
 0x3d6   : > { %vm348_vm7 = vcmp.ge.s32.totalorder %v347_v16, 4 }
 0x3d7   : > { %v349_v63 = vsel %vm348_vm7, %v540_v63, %v331_v3   ;;  %v350_v17 = vsel %vm348_vm7, %v331_v3, %v536_v62  }
 0x3d8   : > { %v535_v62 = vmov %v350_v17   ;;  %vm351_vm8 = vcmp.ge.s32.totalorder (%p322_p0), %v350_v17, 0  ;;  %v352_v18 = vsub.s32 (%p322_p0), 2147483648, %v350_v17 }
 0x3da   :  { %v353_v20 = vsel %vm351_vm8, %v350_v17, %v352_v18 }
 0x3db   :  { %v356_v21 = vsub.f32 %v355_v19, %v353_v20 }
 0x3dd   :  { %v357_v22 = vadd.f32 100.0, %v356_v21 }
 0x3df   :  { %v358_v23 = vmax.f32 %v357_v22, 0.0 }
 0x3e1   :  { %v362_v24 = vsel %vm361_vm9, %v358_v23, 0.0 }
 0x3e2   :  { %363 = vadd.xlane.f32.xlu0 %v362_v24 }
 0x46f   :  { %v364_v25 = vpop.xlane.xlu0 %363 }
 0x470   :  { %v365_v26 = vrot.slane %v364_v25, 4 }
 0x472   :  { %v366_v27 = vadd.f32 %v365_v26, %v364_v25 }
 0x474   :  { %v367_v28 = vrot.slane %v366_v27, 2 }
 0x476   :  { %v368_v29 = vadd.f32 %v367_v28, %v366_v27 }
 0x478   :  { %v369_v30 = vrot.slane %v368_v29, 1 }
 0x47a   :  { %v370_v31 = vadd.f32 %v369_v30, %v368_v29 }
 0x47c   :  { %473 = vpush %v370_v31 }
 0x4ad   :  { %s474_s2 = spop %473 }
 0x4ae   :  { %373 = sst [smem:[#allocation2]] %s474_s2 }
 0x4af   :  { %519 = shalt.err (!%p516_p3)
}
 0x4b0   :  { %s550_s14 = smov [#allocation2]  }
 0x4b1   :  { %381 = dma.smem_to_hbm %s550_s14, 16, %s679_s7, [#allocation3]  }
 0x4b2   :  { %532 = dma.done.wait [#allocation3], 16  }
 0x4b3   :  { %533 = vsyncadd [#allocation3], 4294967280 }
 0x4b4   :  { %385 = sfence }
 0x4b5   :  { %386 = vsyncpa [#allocation3], 1 }

</bundles_post_ra>
